<compile_context>
chip_gen: v7x
topology: tpu7x:2x2x1
jax: 0.10.0
libtpu: 0.0.40
codegen_flags: <defaults>
</compile_context>

<pallas_src>
import functools

import jax
import jax.numpy as jnp
from jax import lax
from jax.experimental import pallas as pl
from jax.experimental.pallas import tpu as pltpu

NEG_BIG = -1e30          # padded-class bias -> exp() == 0 in the softmax
N_CLASSES = 3
N_PAD = 128              # lane-dense padded class dimension


def _nli_kernel(eu_ref, ev_ref, w1_ref, b1_ref, w2_ref, b2_ref,
                w3_ref, b3_ref, out_ref, *, e_dim):
    """One batch tile: AWE-encode both sentences, classify, softmax."""

    def seq_sum_replicated(x_ref):
        # x_ref: (tb, L*E) flattened embeddings (compute dtype).
        # Returns (tb, 128) f32 where EVERY e_dim-lane block holds the raw
        # sequence sum (1/L is folded into W1 in the wrapper).
        x = x_ref[...].astype(jnp.float32)
        n_chunks = x.shape[1] // 128
        y = x[:, 0:128]
        for c in range(1, n_chunks):                  # lane-aligned VPU adds
            y = y + x[:, c * 128:(c + 1) * 128]
        shift = 64                                    # roll+add tree (XLU slot)
        while shift >= e_dim:
            y = y + pltpu.roll(y, shift=shift, axis=1)
            shift //= 2
        return y

    su = seq_sum_replicated(eu_ref)                   # (tb, 128)
    sv = seq_sum_replicated(ev_ref)                   # (tb, 128)

    # concat(u, v, |u-v|, u*v) along the 128-lane axis with no relayout:
    # su/sv already hold the sums replicated in every e_dim-lane block, so a
    # per-block select materializes the feature vector in place.
    lane = lax.broadcasted_iota(jnp.int32, su.shape, 1)
    feats = jnp.where(lane < e_dim, su,
            jnp.where(lane < 2 * e_dim, sv,
            jnp.where(lane < 3 * e_dim, jnp.abs(su - sv), su * sv)))
    feats = feats.astype(w1_ref.dtype)                # bf16 MXU path

    h1 = jnp.tanh(jnp.dot(feats, w1_ref[...],
                          preferred_element_type=jnp.float32) + b1_ref[...])
    h2 = jnp.tanh(jnp.dot(h1.astype(w2_ref.dtype), w2_ref[...],
                          preferred_element_type=jnp.float32) + b2_ref[...])
    logits = (jnp.dot(h2.astype(w3_ref.dtype), w3_ref[...],
                      preferred_element_type=jnp.float32) + b3_ref[...])

    # softmax over the 128 padded classes (padded lanes: exp(-1e30 - m) == 0)
    m = jnp.max(logits, axis=-1, keepdims=True)
    e = jnp.exp(logits - m)
    denom = jnp.sum(e, axis=-1, keepdims=True)
    out_ref[...] = e * pl.reciprocal(denom, approx=True)


def nli_forward(emb_u, emb_v, params, *, tb=None, compute_dtype=jnp.bfloat16):
    """emb_u, emb_v: (B, L, E) float32. Returns softmax probs (B, 3)."""
    w1, b1, w2, b2, w3, b3 = params
    B, L, E = emb_u.shape
    FC = w1.shape[1]
    assert w1.shape[0] == 4 * E
    # TODO(synk): specialized for 4*embedding_dim == 128 (one vreg of lanes)
    # and L*E a multiple of 128; for E >= 128 use the split-W1 formulation.
    assert 4 * E == N_PAD and 128 % E == 0 and (L * E) % 128 == 0

    # --- batch tile: one grid step for small B, 256-row tiles for large B ---
    if tb is None:
        tb = B if B <= 256 else 256
    tb = ((tb + 7) // 8) * 8                 # sublane-align the batch tile
    B_pad = pl.cdiv(B, tb) * tb

    # --- lane-dense embedding layout: (B, L, E) -> (B, L*E), bf16 ---
    eu = emb_u.reshape(B, L * E).astype(compute_dtype)
    ev = emb_v.reshape(B, L * E).astype(compute_dtype)
    if B_pad != B:
        eu = jnp.pad(eu, ((0, B_pad - B), (0, 0)))
        ev = jnp.pad(ev, ((0, B_pad - B), (0, 0)))

    # --- fold the 1/L mean into W1 (kernel feeds raw sequence sums) ---
    row_scale = jnp.concatenate([
        jnp.full((3 * E,), 1.0 / L, jnp.float32),
        jnp.full((E,), 1.0 / (L * L), jnp.float32)])[:, None]
    w1p = (w1 * row_scale).astype(compute_dtype)
    w2p = w2.astype(compute_dtype)

    # --- lane-dense 128-class head: zero weights / -1e30 bias on padding ---
    w3p = jnp.zeros((FC, N_PAD), jnp.float32).at[:, :N_CLASSES].set(w3)
    w3p = w3p.astype(compute_dtype)
    b3p = jnp.full((1, N_PAD), NEG_BIG, jnp.float32).at[:, :N_CLASSES].set(b3)
    b1p = b1.astype(jnp.float32)
    b2p = b2.astype(jnp.float32)

    grid = (B_pad // tb,)
    # Resident weights: constant index maps -> DMA'd once, stay in VMEM.
    # (pipeline_mode=pl.Buffered(1) only becomes relevant at FC in the 1000s.)
    resident = lambda a: pl.BlockSpec(a.shape, lambda i: (0,) * a.ndim)

    out = pl.pallas_call(
        functools.partial(_nli_kernel, e_dim=E),
        out_shape=jax.ShapeDtypeStruct((B_pad, N_PAD), jnp.float32),
        grid=grid,
        in_specs=[
            pl.BlockSpec((tb, L * E), lambda i: (i, 0)),   # emb_u tile
            pl.BlockSpec((tb, L * E), lambda i: (i, 0)),   # emb_v tile
            resident(w1p), resident(b1p),
            resident(w2p), resident(b2p),
            resident(w3p), resident(b3p),
        ],
        out_specs=pl.BlockSpec((tb, N_PAD), lambda i: (i, 0)),
        compiler_params=pltpu.CompilerParams(
            dimension_semantics=("parallel",)),   # megacore sharding on v7x
    )(eu, ev, w1p, b1p, w2p, b2p, w3p, b3p)

    return out[:B, :N_CLASSES]


def init_params(key, embedding_dim, fc_dim):
    encode_size = 4 * embedding_dim
    ks = jax.random.split(key, 6)

    def lin(kw, kb, fan_in, fan_out):
        bound = 1.0 / jnp.sqrt(fan_in)
        w = jax.random.uniform(kw, (fan_in, fan_out), jnp.float32, -bound, bound)
        b = jax.random.uniform(kb, (1, fan_out), jnp.float32, -bound, bound)
        return w, b

    w1, b1 = lin(ks[0], ks[1], encode_size, fc_dim)
    w2, b2 = lin(ks[2], ks[3], fc_dim, fc_dim)
    w3, b3 = lin(ks[4], ks[5], fc_dim, 3)
    return (w1, b1, w2, b2, w3, b3)


if __name__ == "__main__":
    # TODO(synk): only the AWE encoder path is implemented (LSTM/BLSTM
    # encoder variants of NLINet are out of scope for this kernel).
    B, L, E, FC = 16, 8, 32, 64   # batch, seq len, embedding_dim, fc_dim

    key = jax.random.PRNGKey(0)
    k_u, k_v, k_p = jax.random.split(key, 3)
    emb_u = jax.random.normal(k_u, (B, L, E), jnp.float32)   # texts[0][0]
    emb_v = jax.random.normal(k_v, (B, L, E), jnp.float32)   # texts[1][0]
    params = init_params(k_p, E, FC)

    # reference check in plain JAX (f32, exact module semantics)
    u = jnp.mean(emb_u, axis=1)
    v = jnp.mean(emb_v, axis=1)
    feats = jnp.concatenate([u, v, jnp.abs(u - v), u * v], axis=1)
    w1, b1, w2, b2, w3, b3 = params
    h1 = jnp.tanh(feats @ w1 + b1)
    h2 = jnp.tanh(h1 @ w2 + b2)
    ref = jax.nn.softmax(h2 @ w3 + b3, axis=1)

    # f32 compute path: tight check (approx reciprocal ~1e-4 level)
    out_f32 = jax.block_until_ready(
        nli_forward(emb_u, emb_v, params, compute_dtype=jnp.float32))
    assert out_f32.shape == (B, 3)
    assert jnp.allclose(out_f32, ref, atol=1e-3, rtol=1e-3)

    # bf16 compute path (default / fast): relaxed check
    out_bf16 = jax.block_until_ready(nli_forward(emb_u, emb_v, params))
    assert out_bf16.shape == (B, 3)
    assert jnp.allclose(out_bf16, ref, atol=2e-2, rtol=2e-2)

    print("KERNEL_OK")
</pallas_src>

<mosaic_0001>
module attributes {stable_mosaic.version = 11 : i64} {
  func.func @_nli_kernel(%arg0: i32, %arg1: memref<16x256xf32, #tpu.memory_space<vmem>>, %arg2: memref<16x256xf32, #tpu.memory_space<vmem>>, %arg3: memref<128x64xf32, #tpu.memory_space<vmem>>, %arg4: memref<1x64xf32, #tpu.memory_space<vmem>>, %arg5: memref<64x64xf32, #tpu.memory_space<vmem>>, %arg6: memref<1x64xf32, #tpu.memory_space<vmem>>, %arg7: memref<64x128xf32, #tpu.memory_space<vmem>>, %arg8: memref<1x128xf32, #tpu.memory_space<vmem>>, %arg9: memref<16x128xf32, #tpu.memory_space<vmem>>) attributes {dimension_semantics = [#tpu.dimension_semantics<parallel>], iteration_bounds = array<i64: 1>, scalar_prefetch = 0 : i64, scratch_operands = 0 : i64, tpu.core_type = #tpu.core_type<tc>, window_params = [{transform_indices = @transform_0, window_bounds = array<i64: 16, 256>}, {transform_indices = @transform_1, window_bounds = array<i64: 16, 256>}, {pipeline_mode = #tpu.pipeline_mode<synchronous>, transform_indices = @transform_2, window_bounds = array<i64: 128, 64>}, {pipeline_mode = #tpu.pipeline_mode<synchronous>, transform_indices = @transform_3, window_bounds = array<i64: 1, 64>}, {pipeline_mode = #tpu.pipeline_mode<synchronous>, transform_indices = @transform_4, window_bounds = array<i64: 64, 64>}, {pipeline_mode = #tpu.pipeline_mode<synchronous>, transform_indices = @transform_5, window_bounds = array<i64: 1, 64>}, {pipeline_mode = #tpu.pipeline_mode<synchronous>, transform_indices = @transform_6, window_bounds = array<i64: 64, 128>}, {pipeline_mode = #tpu.pipeline_mode<synchronous>, transform_indices = @transform_7, window_bounds = array<i64: 1, 128>}, {transform_indices = @transform_8, window_bounds = array<i64: 16, 128>}]} {
    %c0 = arith.constant 0 : index
    %c0_0 = arith.constant 0 : index
    %0 = vector.load %arg1[%c0, %c0_0] : memref<16x256xf32, #tpu.memory_space<vmem>>, vector<16x256xf32>
    %1 = vector.extract_strided_slice %0 {offsets = [0, 0], sizes = [16, 128], strides = [1, 1]} : vector<16x256xf32> to vector<16x128xf32>
    %2 = vector.extract_strided_slice %0 {offsets = [0, 128], sizes = [16, 128], strides = [1, 1]} : vector<16x256xf32> to vector<16x128xf32>
    %3 = arith.addf %1, %2 : vector<16x128xf32>
    %c64_i32 = arith.constant 64 : i32
    %4 = tpu.dynamic_rotate %3 by %c64_i32 dim 1 : vector<16x128xf32>, i32 -> vector<16x128xf32>
    %5 = arith.addf %3, %4 : vector<16x128xf32>
    %c32_i32 = arith.constant 32 : i32
    %6 = tpu.dynamic_rotate %5 by %c32_i32 dim 1 : vector<16x128xf32>, i32 -> vector<16x128xf32>
    %7 = arith.addf %5, %6 : vector<16x128xf32>
    %c0_1 = arith.constant 0 : index
    %c0_2 = arith.constant 0 : index
    %8 = vector.load %arg2[%c0_1, %c0_2] : memref<16x256xf32, #tpu.memory_space<vmem>>, vector<16x256xf32>
    %9 = vector.extract_strided_slice %8 {offsets = [0, 0], sizes = [16, 128], strides = [1, 1]} : vector<16x256xf32> to vector<16x128xf32>
    %10 = vector.extract_strided_slice %8 {offsets = [0, 128], sizes = [16, 128], strides = [1, 1]} : vector<16x256xf32> to vector<16x128xf32>
    %11 = arith.addf %9, %10 : vector<16x128xf32>
    %c64_i32_3 = arith.constant 64 : i32
    %12 = tpu.dynamic_rotate %11 by %c64_i32_3 dim 1 : vector<16x128xf32>, i32 -> vector<16x128xf32>
    %13 = arith.addf %11, %12 : vector<16x128xf32>
    %c32_i32_4 = arith.constant 32 : i32
    %14 = tpu.dynamic_rotate %13 by %c32_i32_4 dim 1 : vector<16x128xf32>, i32 -> vector<16x128xf32>
    %15 = arith.addf %13, %14 : vector<16x128xf32>
    %16 = tpu.iota {dimensions = array<i32: 1>} : vector<16x128xi32>
    %c32_i32_5 = arith.constant 32 : i32
    %17 = vector.broadcast %c32_i32_5 : i32 to vector<16x128xi32>
    %18 = arith.cmpi slt, %16, %17 : vector<16x128xi32>
    %c64_i32_6 = arith.constant 64 : i32
    %19 = vector.broadcast %c64_i32_6 : i32 to vector<16x128xi32>
    %20 = arith.cmpi slt, %16, %19 : vector<16x128xi32>
    %c96_i32 = arith.constant 96 : i32
    %21 = vector.broadcast %c96_i32 : i32 to vector<16x128xi32>
    %22 = arith.cmpi slt, %16, %21 : vector<16x128xi32>
    %23 = arith.subf %7, %15 : vector<16x128xf32>
    %24 = math.absf %23 : vector<16x128xf32>
    %25 = arith.mulf %7, %15 : vector<16x128xf32>
    %26 = arith.select %22, %24, %25 : vector<16x128xi1>, vector<16x128xf32>
    %27 = arith.select %20, %15, %26 : vector<16x128xi1>, vector<16x128xf32>
    %28 = arith.select %18, %7, %27 : vector<16x128xi1>, vector<16x128xf32>
    %c0_7 = arith.constant 0 : index
    %c0_8 = arith.constant 0 : index
    %29 = vector.load %arg3[%c0_7, %c0_8] : memref<128x64xf32, #tpu.memory_space<vmem>>, vector<128x64xf32>
    %cst = arith.constant dense<0.000000e+00> : vector<16x64xf32>
    %30 = tpu.matmul %28, %29, %cst {dimension_numbers = #tpu.dot_dimension_numbers<[1], [0], [0], [1], [0, 0, 1, 1], [], []>} : vector<16x128xf32>, vector<128x64xf32>, vector<16x64xf32> -> vector<16x64xf32>
    %c0_9 = arith.constant 0 : index
    %c0_10 = arith.constant 0 : index
    %31 = vector.load %arg4[%c0_9, %c0_10] : memref<1x64xf32, #tpu.memory_space<vmem>>, vector<1x64xf32>
    %32 = vector.broadcast %31 : vector<1x64xf32> to vector<16x64xf32>
    %33 = arith.addf %30, %32 : vector<16x64xf32>
    %34 = math.tanh %33 : vector<16x64xf32>
    %c0_11 = arith.constant 0 : index
    %c0_12 = arith.constant 0 : index
    %35 = vector.load %arg5[%c0_11, %c0_12] : memref<64x64xf32, #tpu.memory_space<vmem>>, vector<64x64xf32>
    %cst_13 = arith.constant dense<0.000000e+00> : vector<16x64xf32>
    %36 = tpu.matmul %34, %35, %cst_13 {dimension_numbers = #tpu.dot_dimension_numbers<[1], [0], [0], [1], [0, 0, 1, 1], [], []>} : vector<16x64xf32>, vector<64x64xf32>, vector<16x64xf32> -> vector<16x64xf32>
    %c0_14 = arith.constant 0 : index
    %c0_15 = arith.constant 0 : index
    %37 = vector.load %arg6[%c0_14, %c0_15] : memref<1x64xf32, #tpu.memory_space<vmem>>, vector<1x64xf32>
    %38 = vector.broadcast %37 : vector<1x64xf32> to vector<16x64xf32>
    %39 = arith.addf %36, %38 : vector<16x64xf32>
    %40 = math.tanh %39 : vector<16x64xf32>
    %c0_16 = arith.constant 0 : index
    %c0_17 = arith.constant 0 : index
    %41 = vector.load %arg7[%c0_16, %c0_17] : memref<64x128xf32, #tpu.memory_space<vmem>>, vector<64x128xf32>
    %cst_18 = arith.constant dense<0.000000e+00> : vector<16x128xf32>
    %42 = tpu.matmul %40, %41, %cst_18 {dimension_numbers = #tpu.dot_dimension_numbers<[1], [0], [0], [1], [0, 0, 1, 1], [], []>} : vector<16x64xf32>, vector<64x128xf32>, vector<16x128xf32> -> vector<16x128xf32>
    %c0_19 = arith.constant 0 : index
    %c0_20 = arith.constant 0 : index
    %43 = vector.load %arg8[%c0_19, %c0_20] : memref<1x128xf32, #tpu.memory_space<vmem>>, vector<1x128xf32>
    %44 = vector.broadcast %43 : vector<1x128xf32> to vector<16x128xf32>
    %45 = arith.addf %42, %44 : vector<16x128xf32>
    %cst_21 = arith.constant dense<0xFF800000> : vector<16xf32>
    %46 = vector.multi_reduction <maximumf>, %45, %cst_21 [1] : vector<16x128xf32> to vector<16xf32>
    %47 = vector.shape_cast %46 : vector<16xf32> to vector<16x1xf32>
    %48 = vector.broadcast %47 : vector<16x1xf32> to vector<16x128xf32>
    %49 = arith.subf %45, %48 : vector<16x128xf32>
    %50 = math.exp %49 : vector<16x128xf32>
    %cst_22 = arith.constant dense<0.000000e+00> : vector<16xf32>
    %51 = vector.multi_reduction <add>, %50, %cst_22 [1] : vector<16x128xf32> to vector<16xf32>
    %52 = vector.shape_cast %51 : vector<16xf32> to vector<16x1xf32>
    %53 = tpu.reciprocal %52 {approx = true} : vector<16x1xf32> -> vector<16x1xf32>
    %54 = vector.broadcast %53 : vector<16x1xf32> to vector<16x128xf32>
    %55 = arith.mulf %50, %54 : vector<16x128xf32>
    %c0_23 = arith.constant 0 : index
    %c0_24 = arith.constant 0 : index
    %56 = vector.load %arg9[%c0_23, %c0_24] : memref<16x128xf32, #tpu.memory_space<vmem>>, vector<16x128xf32>
    tpu.vector_store %arg9[%c0_23, %c0_24], %55 {strides = array<i32>} : memref<16x128xf32, #tpu.memory_space<vmem>>, vector<16x128xf32>,
    return
  }
  func.func @transform_0(%arg0: i32) -> (i32, i32) {
    %c0_i32 = arith.constant 0 : i32
    %c0_i32_0 = arith.constant 0 : i32
    return %arg0, %c0_i32 : i32, i32
  }
  func.func @transform_1(%arg0: i32) -> (i32, i32) {
    %c0_i32 = arith.constant 0 : i32
    %c0_i32_0 = arith.constant 0 : i32
    return %arg0, %c0_i32 : i32, i32
  }
  func.func @transform_2(%arg0: i32) -> (i32, i32) {
    %c0_i32 = arith.constant 0 : i32
    %c0_i32_0 = arith.constant 0 : i32
    %c0_i32_1 = arith.constant 0 : i32
    return %c0_i32, %c0_i32_0 : i32, i32
  }
  func.func @transform_3(%arg0: i32) -> (i32, i32) {
    %c0_i32 = arith.constant 0 : i32
    %c0_i32_0 = arith.constant 0 : i32
    %c0_i32_1 = arith.constant 0 : i32
    return %c0_i32, %c0_i32_0 : i32, i32
  }
  func.func @transform_4(%arg0: i32) -> (i32, i32) {
    %c0_i32 = arith.constant 0 : i32
    %c0_i32_0 = arith.constant 0 : i32
    %c0_i32_1 = arith.constant 0 : i32
    return %c0_i32, %c0_i32_0 : i32, i32
  }
  func.func @transform_5(%arg0: i32) -> (i32, i32) {
    %c0_i32 = arith.constant 0 : i32
    %c0_i32_0 = arith.constant 0 : i32
    %c0_i32_1 = arith.constant 0 : i32
    return %c0_i32, %c0_i32_0 : i32, i32
  }
  func.func @transform_6(%arg0: i32) -> (i32, i32) {
    %c0_i32 = arith.constant 0 : i32
    %c0_i32_0 = arith.constant 0 : i32
    %c0_i32_1 = arith.constant 0 : i32
    return %c0_i32, %c0_i32_0 : i32, i32
  }
  func.func @transform_7(%arg0: i32) -> (i32, i32) {
    %c0_i32 = arith.constant 0 : i32
    %c0_i32_0 = arith.constant 0 : i32
    %c0_i32_1 = arith.constant 0 : i32
    return %c0_i32, %c0_i32_0 : i32, i32
  }
  func.func @transform_8(%arg0: i32) -> (i32, i32) {
    %c0_i32 = arith.constant 0 : i32
    %c0_i32_0 = arith.constant 0 : i32
    return %arg0, %c0_i32 : i32, i32
  }
}

</mosaic_0001>

<bundles_post_ra>
// kernel: tpu_custom_call.1
= control target key start
LH: loop header
LB: loop body
LE: loop exit
PB: predicated region body
PF: predicated region fallthrough
CT: control target
= control target key end

     0   :  { %s836_s0 = inlined_call_operand.vmem [shape: f32[16,256], index: 0, kind: input, shape index: {}]   ;;  %s837_s1 = inlined_call_operand.vmem [shape: f32[16,256], index: 1, kind: input, shape index: {}]   ;;  %s838_s2 = inlined_call_operand.vmem [shape: f32[128,64], index: 2, kind: input, shape index: {}]   ;;  %s839_s3 = inlined_call_operand.vmem [shape: f32[1,64], index: 3, kind: input, shape index: {}]   ;;  %s840_s4 = inlined_call_operand.vmem [shape: f32[64,64], index: 4, kind: input, shape index: {}]   ;;  %s841_s5 = inlined_call_operand.vmem [shape: f32[1,64], index: 5, kind: input, shape index: {}]   ;;  %s842_s6 = inlined_call_operand.vmem [shape: f32[64,128], index: 6, kind: input, shape index: {}]   ;;  %s843_s7 = inlined_call_operand.vmem [shape: f32[1,128], index: 7, kind: input, shape index: {}]   ;;  %s844_s8 = inlined_call_operand.hbm [shape: f32[16,128], index: 8, kind: output, shape index: {}]  }
   0x1   :  { %v30_v0 = vld [vmem:[%s836_s0] sm:$0xff]  ;;  %v31_v1 = vld [vmem:[%s836_s0 + $0x8] sm:$0xff]  ;;  %v32_v2 = vld [vmem:[%s836_s0 + $0x10] sm:$0xff] }
   0x2   :  { %v34_v3 = vadd.f32 %v31_v1, %v30_v0  ;;  %v33_v4 = vld [vmem:[%s836_s0 + $0x18] sm:$0xff]  ;;  %v48_v5 = vld [vmem:[%s837_s1] sm:$0xff]  ;;  %v49_v6 = vld [vmem:[%s837_s1 + $0x8] sm:$0xff]  ;;  %s641_s0 = smov 64  }
   0x3   :  { %v35_v7 = vadd.f32 %v33_v4, %v32_v2  ;;  %v50_v8 = vld [vmem:[%s837_s1 + $0x10] sm:$0xff]  ;;  %v51_v9 = vld [vmem:[%s837_s1 + $0x18] sm:$0xff]  ;;  %v83_v10 = vld [vmem:[%s838_s2] sm:$0xff]  ;;  %v52_v11 = vadd.f32 %v49_v6, %v48_v5 }
   0x4   :  { %36 = vrot.lane.b32.xlu0 %v34_v3, %s641_s0  ;;  %v84_v12 = vld [vmem:[%s838_s2 + $0x8] sm:$0xff]  ;;  %v85_v13 = vld [vmem:[%s838_s2 + $0x10] sm:$0xff]  ;;  %v86_v14 = vld [vmem:[%s838_s2 + $0x18] sm:$0xff]  ;;  %v53_v15 = vadd.f32 %v51_v9, %v50_v8 }
   0x5   :  { %38 = vrot.lane.b32.xlu1 %v35_v7, %s641_s0  ;;  %v532_v16 = vpack.c.bf16 %v84_v12, %v83_v10  ;;  %v536_v17 = vpack.c.bf16 %v86_v14, %v85_v13  ;;  %v87_v18 = vld [vmem:[%s838_s2 + $0x20] sm:$0xff]  ;;  %v88_v19 = vld [vmem:[%s838_s2 + $0x28] sm:$0xff] }
   0x6   :  { %13 = vsyncpa [#allocation3], 0  ;;  %v540_v20 = vpack.c.bf16 %v88_v19, %v87_v18  ;;  %v89_v21 = vld [vmem:[%s838_s2 + $0x30] sm:$0xff]  ;;  %v90_v22 = vld [vmem:[%s838_s2 + $0x38] sm:$0xff]  ;;  %s642_s1 = smov 32   ;;  %v66_v45 = vlaneseq  ;;  %vm198_vm3 = vcmask 523264  }
   0x7   :  { %533 = vmatprep.subr.bf16.mxu0 %v532_v16  ;;  %v544_v23 = vpack.c.bf16 %v90_v22, %v89_v21  ;;  %v91_v24 = vld [vmem:[%s838_s2 + $0x40] sm:$0xff]  ;;  %v92_v25 = vld [vmem:[%s838_s2 + $0x48] sm:$0xff]  ;;  %v93_v27 = vld [vmem:[%s838_s2 + $0x50] sm:$0xff] }
   0x8   :  { %54 = vrot.lane.b32.xlu0 %v52_v11, %s641_s0  ;;  %535 = vmatpush3.bf16.msra.mxu0 %v532_v16  ;;  %v548_v26 = vpack.c.bf16 %v92_v25, %v91_v24  ;;  %v94_v28 = vld [vmem:[%s838_s2 + $0x58] sm:$0xff]  ;;  %v95_v30 = vld [vmem:[%s838_s2 + $0x60] sm:$0xff]  ;;  %v96_v31 = vld [vmem:[%s838_s2 + $0x68] sm:$0xff]  ;;  %v67_v47 = vand.u32 127, %v66_v45 }
   0x9   :  { %56 = vrot.lane.b32.xlu1 %v53_v15, %s641_s0  ;;  %537 = vmatprep.subr.bf16.mxu0 %v536_v17  ;;  %v552_v29 = vpack.c.bf16 %v94_v28, %v93_v27  ;;  %v556_v32 = vpack.c.bf16 %v96_v31, %v95_v30  ;;  %v97_v34 = vld [vmem:[%s838_s2 + $0x70] sm:$0xff]  ;;  %v98_v35 = vld [vmem:[%s838_s2 + $0x78] sm:$0xff]  ;;  %v183_v2 = vld [vmem:[%s840_s4] sm:$0xff] }
   0xa   :  { %v560_v38 = vpack.c.bf16 %v98_v35, %v97_v34  ;;  %vm69_vm0 = vcmp.lt.s32.totalorder %v67_v47, 64  ;;  %vm70_vm1 = vcmp.lt.s32.totalorder %v67_v47, 96  ;;  %vm68_vm2 = vcmp.lt.s32.totalorder %v67_v47, 32  ;;  %v185_v5 = vld [vmem:[%s840_s4 + $0x10] sm:$0xff]  ;;  %v186_v6 = vld [vmem:[%s840_s4 + $0x18] sm:$0xff]  ;;  %v187_v8 = vld [vmem:[%s840_s4 + $0x20] sm:$0xff] }
   0xb   :  { %v188_v9 = vld [vmem:[%s840_s4 + $0x28] sm:$0xff]  ;;  %v189_v10 = vld [vmem:[%s840_s4 + $0x30] sm:$0xff]  ;;  %v190_v12 = vld [vmem:[%s840_s4 + $0x38] sm:$0xff] }
   0xc   :  { %539 = vmatpush3.bf16.msra.mxu0 %v536_v17  ;;  %v576_v13 = vpack.c.bf16 %v190_v12, %v189_v10  ;;  %v414_v14 = vld [vmem:[%s839_s3] ss:$0 sm:$0xff]  ;;  %v283_v22 = vld [vmem:[%s842_s6 + $0x8] sm:$0xff]  ;;  %v284_v24 = vld [vmem:[%s842_s6 + $0x10] sm:$0xff] }
   0xd   :  { %541 = vmatprep.subr.bf16.mxu0 %v540_v20  ;;  %v282_v21 = vld [vmem:[%s842_s6] sm:$0xff]  ;;  %v285_v25 = vld [vmem:[%s842_s6 + $0x18] sm:$0xff]  ;;  %v287_v28 = vld [vmem:[%s842_s6 + $0x28] sm:$0xff] }
   0xe   :  { %v286_v27 = vld [vmem:[%s842_s6 + $0x20] sm:$0xff]  ;;  %v289_v31 = vld [vmem:[%s842_s6 + $0x38] sm:$0xff] }
   0xf   :  { %v588_v30 = vpack.c.bf16 %v287_v28, %v286_v27 }
  0x10   :  { %543 = vmatpush3.bf16.msra.mxu0 %v540_v20 }
  0x11   :  { %545 = vmatprep.subr.bf16.mxu0 %v544_v23 }
  0x14   :  { %547 = vmatpush3.bf16.msra.mxu0 %v544_v23  ;;  %v580_v23 = vpack.c.bf16 %v283_v22, %v282_v21 }
  0x15   :  { %549 = vmatprep.subr.bf16.mxu0 %v548_v26 }
  0x18   :  { %551 = vmatpush3.bf16.msra.mxu0 %v548_v26  ;;  %v584_v26 = vpack.c.bf16 %v285_v25, %v284_v24 }
  0x19   :  { %553 = vmatprep.subr.bf16.mxu0 %v552_v29 }
  0x1c   :  { %555 = vmatpush3.bf16.msra.mxu0 %v552_v29  ;;  %v288_v29 = vld [vmem:[%s842_s6 + $0x30] sm:$0xff] }
  0x1d   :  { %557 = vmatprep.subr.bf16.mxu0 %v556_v32 }
  0x20   :  { %559 = vmatpush3.bf16.msra.mxu0 %v556_v32  ;;  %v592_v32 = vpack.c.bf16 %v289_v31, %v288_v29 }
  0x21   :  { %561 = vmatprep.subr.bf16.mxu0 %v560_v38 }
  0x24   :  { %563 = vmatpush3.bf16.msra.mxu0 %v560_v38 }
  0x76   :  { %v37_v33 = vpop.permute.xlu0 %36 }
  0x77   :  { %v40_v36 = vadd.f32 %v37_v33, %v34_v3  ;;  %v39_v37 = vpop.permute.xlu1 %38  ;;  %v184_v3 = vld [vmem:[%s840_s4 + $0x8] sm:$0xff]  ;;  %v415_v33 = vld [vmem:[%s841_s5] ss:$0 sm:$0xff]  ;;  %s643_s5 = smov [#allocation2]  }
  0x78   :  { %v41_v39 = vadd.f32 %v39_v37, %v35_v7  ;;  %v564_v4 = vpack.c.bf16 %v184_v3, %v183_v2  ;;  %v568_v7 = vpack.c.bf16 %v186_v6, %v185_v5 }
  0x79   :  { %42 = vrot.lane.b32.xlu0 %v40_v36, %s642_s1 }
  0x7a   :  { %v55_v40 = vpop.permute.xlu0 %54  ;;  %565 = vmatprep.subr.bf16.mxu1 %v564_v4 }
  0x7b   :  { %v58_v41 = vadd.f32 %v55_v40, %v52_v11  ;;  %v57_v42 = vpop.permute.xlu1 %56  ;;  %567 = vmatpush3.bf16.msra.mxu1 %v564_v4  ;;  %v572_v11 = vpack.c.bf16 %v188_v9, %v187_v8  ;;  %v418_v40 = vld [vmem:[%s843_s7] ss:$0 sm:$0xff]  ;;  %s403_s7 = sshll.u32 %s643_s5, 4  ;;  %s404_s7 = int_to_ptr.vmem [resolvable:$true] %s403_s7 }
  0x7c   :  { %v59_v43 = vadd.f32 %v57_v42, %v53_v15  ;;  %569 = vmatprep.subr.bf16.mxu1 %v568_v7  ;;  %s617_s16 = scalar_lea.vmem %s404_s7, 256  ;;  %p622_p1 = scmp.lt.s32.totalorder %s404_s7, %s404_s7 }
  0x7d   :  { %44 = vrot.lane.b32.xlu0 %v41_v39, %s642_s1  ;;  %60 = vrot.lane.b32.xlu1 %v58_v41, %s642_s1  ;;  %p618_p0 = scmp.ne.s32.totalorder %s404_s7, %s617_s16  ;;  %p623_p2 = scmp.lt.s32.totalorder %s617_s16, %s617_s16 }
  0x7f   :  { %571 = vmatpush3.bf16.msra.mxu1 %v568_v7  ;;  %p624_p3 = por %p623_p2, %p622_p1 }
  0x80   :  { %573 = vmatprep.subr.bf16.mxu1 %v572_v11 }
  0x81   :  { %62 = vrot.lane.b32.xlu1 %v59_v43, %s642_s1  ;;  %p625_p4 = pnand %p624_p3, %p618_p0 }
  0x83   :  { %575 = vmatpush3.bf16.msra.mxu1 %v572_v11 }
  0x84   :  { %577 = vmatprep.subr.bf16.mxu1 %v576_v13 }
  0x87   :  { %579 = vmatpush3.bf16.msra.mxu1 %v576_v13 }
  0x88   :  { %581 = vmatprep.subr.bf16.mxu1 %v580_v23 }
  0xeb   :  { %v43_v44 = vpop.permute.xlu0 %42 }
  0xec   :  { %v46_v48 = vadd.f32 %v43_v44, %v40_v36 }
  0xef   :  { %v61_v46 = vpop.permute.xlu1 %60  ;;  %v45_v50 = vpop.permute.xlu0 %44 }
  0xf0   :  { %v64_v49 = vadd.f32 %v61_v46, %v58_v41  ;;  %v47_v55 = vadd.f32 %v45_v50, %v41_v39 }
  0xf2   :  { %v71_v51 = vsub.f32 %v46_v48, %v64_v49  ;;  %v75_v54 = vmul.f32 %v64_v49, %v46_v48 }
  0xf3   :  { %v63_v52 = vpop.permute.xlu1 %62 }
  0xf4   :  { %v73_v53 = vand.u32 2147483647, %v71_v51  ;;  %v65_v56 = vadd.f32 %v63_v52, %v59_v43 }
  0xf6   :  { %v72_v57 = vsub.f32 %v47_v55, %v65_v56  ;;  %v77_v58 = vsel %vm70_vm1, %v73_v53, %v75_v54  ;;  %v76_v61 = vmul.f32 %v65_v56, %v47_v55 }
  0xf7   :  { %v79_v59 = vsel %vm69_vm0, %v64_v49, %v77_v58 }
  0xf8   :  { %v74_v60 = vand.u32 2147483647, %v72_v57  ;;  %v81_v62 = vsel %vm68_vm2, %v46_v48, %v79_v59 }
  0xf9   :  { %491 = vmatprep.mubr.f32.mxu0 %v81_v62 }
  0xfa   :  { %v78_v63 = vsel %vm70_vm1, %v74_v60, %v76_v61 }
  0xfb   :  { %v80_v0 = vsel %vm69_vm0, %v65_v56, %v78_v63 }
  0xfc   :  { %v82_v1 = vsel %vm68_vm2, %v47_v55, %v80_v0 }
  0xfd   :  { %492 = vmatmul.mubr.f32.vlgmr.msra.gmra.mrb[0].mxu0 %v82_v1 }
 0x1d0   :  { %v493_v15 = vpop.f32.mrb[0].mxu0 }
 0x1d1   :  { %v178_v16 = vadd.f32 %v493_v15, %v414_v14  ;;  %v172_v17 = vpop.f32.mrb[1].mxu0 }
 0x1d2   :  { %v173_v18 = vadd.f32 %v414_v14, %v172_v17 }
 0x1d4   :  { %601 = vtanh.f32 %v173_v18 }
 0x1d5   :  { %603 = vtanh.f32 %v178_v16 }
 0x1de   :  { %v602_v19 = vpop.eup %601 }
 0x1df   :  { %v604_v20 = vpop.eup %603  ;;  %510 = vmatprep.mubr.msk.f32.mxu1 %vm198_vm3, %v602_v19 }
 0x1e0   :  { %511 = vmatmul.mubr.msk.f32.vlgmr.msra.gmra.mrb[0].mxu1 %vm198_vm3, %v604_v20 }
 0x1e1   :  { %583 = vmatpush3.bf16.msra.mxu1 %v580_v23 }
 0x1e2   :  { %585 = vmatprep.subr.bf16.mxu1 %v584_v26 }
 0x1e5   :  { %587 = vmatpush3.bf16.msra.mxu1 %v584_v26 }
 0x1e6   :  { %589 = vmatprep.subr.bf16.mxu1 %v588_v30 }
 0x1e9   :  { %591 = vmatpush3.bf16.msra.mxu1 %v588_v30 }
 0x1ea   :  { %593 = vmatprep.subr.bf16.mxu1 %v592_v32 }
 0x1ed   :  { %595 = vmatpush3.bf16.msra.mxu1 %v592_v32 }
 0x2b3   :  { %v512_v34 = vpop.f32.mrb[0].mxu1 }
 0x2b4   :  { %v277_v35 = vadd.f32 %v512_v34, %v415_v33  ;;  %v271_v36 = vpop.f32.mrb[1].mxu1 }
 0x2b5   :  { %v272_v37 = vadd.f32 %v415_v33, %v271_v36 }
 0x2b7   :  { %605 = vtanh.f32 %v272_v37 }
 0x2b8   :  { %607 = vtanh.f32 %v277_v35 }
 0x2c1   :  { %v606_v38 = vpop.eup %605 }
 0x2c2   :  { %v608_v39 = vpop.eup %607  ;;  %529 = vmatprep.mubr.msk.f32.mxu1 %vm198_vm3, %v606_v38 }
 0x2c3   :  { %530 = vmatmul.mubr.msk.f32.vlgmr.msra.gmra.mrb[2].mxu1 %vm198_vm3, %v608_v39 }
 0x396   :  { %v531_v41 = vpop.f32.mrb[2].mxu1 }
 0x397   :  { %v375_v42 = vadd.f32 %v531_v41, %v418_v40  ;;  %v369_v43 = vpop.f32.mrb[3].mxu1 }
 0x398   :  { %v370_v44 = vadd.f32 %v418_v40, %v369_v43 }
 0x399   :  { %380 = vmax.xlane.f32.xlu1 %v375_v42 }
 0x39a   :  { %378 = vmax.xlane.f32.xlu0 %v370_v44 }
 0x426   :  { %v381_v45 = vpop.xlane.xlu1 %380 }
 0x427   :  { %v379_v46 = vpop.xlane.xlu0 %378  ;;  %v383_v47 = vsub.f32 %v375_v42, %v381_v45 }
 0x428   :  { %v382_v48 = vsub.f32 %v370_v44, %v379_v46 }
 0x429   :  { %v386_v50 = vmul.f32 1.442695, %v383_v47 }
 0x42a   :  { %v384_v49 = vmul.f32 1.442695, %v382_v48 }
 0x42c   :  { %609 = vpow2.f32 %v384_v49 }
 0x42d   :  { %611 = vpow2.f32 %v386_v50 }
 0x436   :  { %v610_v51 = vpop.eup %609 }
 0x437   :  { %388 = vadd.xlane.f32.xlu0 %v610_v51  ;;  %v612_v52 = vpop.eup %611 }
 0x43b   :  { %390 = vadd.xlane.f32.xlu0 %v612_v52 }
 0x4c4   :  { %v389_v53 = vpop.xlane.xlu0 %388 }
 0x4c5   :  { %613 = vrcp.f32 %v389_v53 }
 0x4c8   :  { %v391_v54 = vpop.xlane.xlu0 %390 }
 0x4c9   :  { %615 = vrcp.f32 %v391_v54 }
 0x4cf   :  { %v614_v55 = vpop.eup %613 }
 0x4d0   :  { %v394_v56 = vmul.f32 %v614_v55, %v610_v51 }
 0x4d2   :  { %396 = vst [vmem:[#allocation2] sm:$0xff] %v394_v56 }
 0x4d3   :  { %v616_v57 = vpop.eup %615 }
 0x4d4   :  { %v395_v58 = vmul.f32 %v616_v57, %v612_v52 }
 0x4d6   :  { %397 = vst [vmem:[#allocation2 + $0x8] sm:$0xff] %v395_v58 }
 0x4d7   :  { %628 = shalt.err (!%p625_p4)
}
 0x4d8   :  { %s629_s19 = scalar_lea.hbm %s844_s8, 256 }
 0x4d9   :  { %p630_p5 = scmp.ne.s32.totalorder %s844_s8, %s629_s19  ;;  %p633_p6 = scmp.lt.u32.totalorder %s629_s19, %s844_s8 }
 0x4db   :  { %p635_p7 = pnand %p633_p6, %p630_p5 }
 0x4dd   :  { %638 = shalt.err (!%p635_p7)
}
 0x4de   :  { %s644_s4 = smov 128   ;;  %s645_s23 = smov 8  }
 0x4df   :  { %409 = dma.vmem_to_hbm [thread:$0]  %s404_s7, 256, %s844_s8, [#allocation3], %s644_s4, %s644_s4, %s645_s23  }
 0x4e0   :  { %639 = dma.done.wait [#allocation3], 256  }
 0x4e1   :  { %640 = vsyncadd [#allocation3], 4294967040 }
 0x4e2   :  { %413 = vsyncpa [#allocation3], 1 }

</bundles_post_ra>
